<compile_context>
chip_gen: v7x
topology: tpu7x:2x2x1
jax: 0.10.0
libtpu: 0.0.40
codegen_flags: <defaults>
</compile_context>

<pallas_src>
import math

import jax
import jax.numpy as jnp
from jax.experimental import pallas as pl
from jax.experimental.pallas import tpu as pltpu


def _round_up(x, m):
    return (x + m - 1) // m * m


# ----------------------------- Pallas kernel --------------------------------
def _adapter_kernel(x_ref, w_in_t_ref, w_out_t_ref, o_ref):
    """Fused LoRA-adapter hot path for one row tile.

    x_ref      : (tm, H_pad)     VMEM, streamed per grid step, native input dtype
    w_in_t_ref : (H_pad, D_pad)  VMEM, grid-invariant (DMA'd once), compute dtype
    w_out_t_ref: (D_pad, O_pad)  VMEM, grid-invariant, alpha/dim pre-folded, compute dtype
    o_ref      : (tm, O_pad)     VMEM, lane-dense output tile, x.dtype
    """
    # Cast in VMEM (not in HBM) so x is streamed once in its native dtype.
    x = x_ref[...].astype(w_in_t_ref.dtype)
    # linear_in: x @ W_in^T   (MXU, f32 accumulation)
    h = jnp.dot(x, w_in_t_ref[...], preferred_element_type=jnp.float32)
    # activation: swish / SiLU (sigmoid on the f32 accumulator -> EUP slot)
    h = h * jax.nn.sigmoid(h)
    # linear_out: h @ (W_out^T * alpha/dim)   (MXU, f32 accumulation)
    y = jnp.dot(h.astype(w_out_t_ref.dtype), w_out_t_ref[...],
                preferred_element_type=jnp.float32)
    o_ref[...] = y.astype(o_ref.dtype)


# --------------------------- tiling / VMEM budget ----------------------------
def _vmem_capacity_bytes():
    try:
        return int(pltpu.get_tpu_info().vmem_capacity_bytes)
    except Exception:
        return 64 * 1024 * 1024  # conservative (v7x) fallback


def _vmem_bytes_estimate(tm, h_pad, d_pad, o_pad, x_bytes, w_bytes, out_bytes,
                         weight_bufs):
    """Rough VMEM footprint for one pipelined row tile."""
    x_buf = 2 * tm * h_pad * x_bytes                      # double-buffered x tile
    o_buf = 2 * tm * o_pad * out_bytes                    # double-buffered out tile
    w_buf = weight_bufs * (h_pad * d_pad + d_pad * o_pad) * w_bytes  # resident weights
    # in-kernel x cast + f32 h / silu(h) + f32 y accumulator
    interm = tm * h_pad * w_bytes + tm * d_pad * 4 * 2 + tm * o_pad * 4
    return x_buf + o_buf + w_buf + interm


_TM_CANDIDATES = (1024, 896, 768, 640, 512, 384, 256, 128, 64, 32, 16, 8)


def _pick_tm(n_rows, h_pad, d_pad, o_pad, x_bytes, w_bytes, out_bytes,
             weight_bufs, budget_bytes):
    """Largest row tile (multiples of 128 preferred) that fits the VMEM budget."""
    tm = 8
    for cand in _TM_CANDIDATES:
        if _vmem_bytes_estimate(cand, h_pad, d_pad, o_pad, x_bytes, w_bytes,
                                out_bytes, weight_bufs) <= budget_bytes:
            tm = cand
            break
    # Never ask for more rows than exist, and keep >=2 grid steps so the 'parallel'
    # axis can be sharded across both v7x TensorCores (harmless extra step elsewhere).
    tm = min(tm, _round_up(n_rows, 8), _round_up(pl.cdiv(n_rows, 2), 8))
    return max(tm, 8)


# ------------------------------- wrapper -------------------------------------
def _call_pallas(x2d, w_in_t, w_out_t, *, tm, out_dtype, vmem_limit, cost,
                 single_buffer_weights):
    N, H_pad = x2d.shape
    _, D_pad = w_in_t.shape
    _, O_pad = w_out_t.shape

    w_kwargs = {}
    if single_buffer_weights and hasattr(pl, "Buffered"):
        # Grid-invariant blocks -> single buffer (the second buffer is pure VMEM waste).
        w_kwargs = dict(pipeline_mode=pl.Buffered(1))

    return pl.pallas_call(
        _adapter_kernel,
        out_shape=jax.ShapeDtypeStruct((N, O_pad), out_dtype),
        grid_spec=pltpu.PrefetchScalarGridSpec(
            num_scalar_prefetch=0,
            grid=(pl.cdiv(N, tm),),               # partial last row block is masked
            in_specs=[
                pl.BlockSpec((tm, H_pad), lambda i: (i, 0)),               # x (streamed)
                pl.BlockSpec((H_pad, D_pad), lambda i: (0, 0), **w_kwargs),  # W_in^T
                pl.BlockSpec((D_pad, O_pad), lambda i: (0, 0), **w_kwargs),  # W_out^T*s
            ],
            out_specs=pl.BlockSpec((tm, O_pad), lambda i: (i, 0)),
        ),
        compiler_params=pltpu.CompilerParams(
            dimension_semantics=("parallel",),
            vmem_limit_bytes=vmem_limit,
        ),
        cost_estimate=cost,
    )(x2d, w_in_t, w_out_t)


def parallel_linear_adapter_forward(x, w_in, w_out, alpha, dim, *,
                                    compute_dtype=jnp.bfloat16,
                                    out_dtype=None,
                                    tm=None):
    """x: [S, B, H].  w_in: (dim, in_features).  w_out: (out_features, dim)."""
    S, B, H = x.shape
    out_features, dim_w = w_out.shape
    assert dim_w == dim and w_in.shape == (dim, H)

    if out_dtype is None:
        out_dtype = x.dtype  # match the PyTorch module (adapter feeds an f32 residual)

    N = S * B
    H_pad = _round_up(H, 128)             # feature-axis pads are required for correctness
    D_pad = _round_up(dim, 128)           # rank padded to 128 only (HBM-bound; see header)
    O_pad = _round_up(out_features, 128)  # lane-dense output -> unmasked stores

    x_bytes = jnp.dtype(x.dtype).itemsize
    w_bytes = jnp.dtype(compute_dtype).itemsize
    out_bytes = jnp.dtype(out_dtype).itemsize

    # Generation-aware VMEM sizing (v5e/v6e: 128 MiB, v7x: 64 MiB).
    cap = _vmem_capacity_bytes()
    budget = int(0.70 * cap)
    if tm is None:
        tm = _pick_tm(N, H_pad, D_pad, O_pad, x_bytes, w_bytes, out_bytes,
                      weight_bufs=1, budget_bytes=budget)

    scale = float(alpha) / float(dim)

    # ---- glue (outside the kernel) ----
    # x: flatten rows only; pad the feature axis iff needed.  No row padding, no pre-cast.
    x2d = x.reshape(N, H)
    if H_pad != H:
        x2d = jnp.pad(x2d, ((0, 0), (0, H_pad - H)))
    # Weights are tiny: pad, fold alpha/dim into the second one (in f32), cast once.
    w_in_t = jnp.pad(w_in.T, ((0, H_pad - H), (0, D_pad - dim))).astype(compute_dtype)
    w_out_t = jnp.pad(w_out.T * scale,
                      ((0, D_pad - dim), (0, O_pad - out_features))).astype(compute_dtype)

    est = _vmem_bytes_estimate(tm, H_pad, D_pad, O_pad, x_bytes, w_bytes, out_bytes,
                               weight_bufs=1)
    vmem_limit = min(int(0.90 * cap), max(32 * 1024 * 1024, int(est) + 8 * 1024 * 1024))

    cost = pl.CostEstimate(
        flops=2 * N * (H_pad * D_pad + D_pad * O_pad),
        transcendentals=N * D_pad,                       # sigmoid
        bytes_accessed=(x2d.size * x_bytes
                        + (w_in_t.size + w_out_t.size) * w_bytes
                        + N * O_pad * out_bytes),
    )

    try:
        y2d = _call_pallas(x2d, w_in_t, w_out_t, tm=tm, out_dtype=out_dtype,
                           vmem_limit=vmem_limit, cost=cost,
                           single_buffer_weights=True)
    except Exception:
        # Fallback for Pallas versions where pl.Buffered(1) is rejected.
        y2d = _call_pallas(x2d, w_in_t, w_out_t, tm=tm, out_dtype=out_dtype,
                           vmem_limit=vmem_limit, cost=cost,
                           single_buffer_weights=False)

    if O_pad != out_features:
        y2d = y2d[:, :out_features]
    return y2d.reshape(S, B, out_features)


# --------------------------- parameter init ----------------------------------
def _xavier_normal(key, shape):
    # nn.init.xavier_normal_ on a (fan_out, fan_in) weight
    fan_out, fan_in = shape
    std = math.sqrt(2.0 / (fan_in + fan_out))
    return std * jax.random.normal(key, shape, dtype=jnp.float32)


def _normal_init(key, shape, sigma=0.2):
    # init_method_normal(0.2) -- row_init_method='normal' (non-trivial output for testing;
    # the module default 'zero' would make the adapter output identically zero)
    return sigma * jax.random.normal(key, shape, dtype=jnp.float32)


# ------------------------------- reference -----------------------------------
def _reference_forward(x, w_in, w_out, alpha, dim):
    h = jnp.einsum("sbh,dh->sbd", x, w_in)
    h = h * jax.nn.sigmoid(h)
    y = jnp.einsum("sbd,od->sbo", h, w_out)
    return y * (alpha / dim)


# --------------------------------- main ---------------------------------------
if __name__ == "__main__":
    key = jax.random.PRNGKey(0)

    # Case 1: small shapes consistent with the module (seq=8, batch=2, hidden=32, rank=8,
    # out=32).  Feature axes need padding here; exercises the padded fallback path.
    S, B = 8, 2
    in_features, out_features, dim = 32, 32, 8
    alpha = 16.0  # alpha/dim = 2.0 (module default would be alpha=dim -> 1.0)

    k_x, k_in, k_out, k_x2, k_in2, k_out2 = jax.random.split(key, 6)
    x = jax.random.normal(k_x, (S, B, in_features), dtype=jnp.float32)
    w_in = _xavier_normal(k_in, (dim, in_features))        # column_init_method='xavier'
    w_out = _normal_init(k_out, (out_features, dim))       # row_init_method='normal'

    y_ref = _reference_forward(x, w_in, w_out, alpha, dim)

    # 1a) f32 compute path: validates exact forward semantics.
    y_f32 = parallel_linear_adapter_forward(x, w_in, w_out, alpha, dim,
                                            compute_dtype=jnp.float32)
    y_f32 = jax.block_until_ready(y_f32)
    assert y_f32.shape == (S, B, out_features)
    assert y_f32.dtype == x.dtype
    assert jnp.allclose(y_f32, y_ref, atol=1e-4, rtol=1e-4), "f32 mismatch vs reference"

    # 1b) bf16 compute path (default / performance config).
    y_bf16 = parallel_linear_adapter_forward(x, w_in, w_out, alpha, dim)
    y_bf16 = jax.block_until_ready(y_bf16)
    assert y_bf16.shape == (S, B, out_features)
    assert y_bf16.dtype == x.dtype            # output returned in x.dtype (module semantics)
    assert jnp.allclose(y_bf16, y_ref, atol=5e-2, rtol=5e-2), "bf16 mismatch vs reference"

    # Case 2: 128-aligned features and a non-multiple row count -> exercises the
    # fast path (no feature pad, no output slice, cdiv grid with a masked partial
    # last row block and >=2 grid steps).
    S2, B2 = 9, 2
    in2, out2, dim2 = 128, 256, 8
    x2 = jax.random.normal(k_x2, (S2, B2, in2), dtype=jnp.float32)
    w_in2 = _xavier_normal(k_in2, (dim2, in2))
    w_out2 = _normal_init(k_out2, (out2, dim2))
    y2_ref = _reference_forward(x2, w_in2, w_out2, dim2, dim2)  # alpha=dim -> scale 1.0

    y2 = parallel_linear_adapter_forward(x2, w_in2, w_out2, dim2, dim2)
    y2 = jax.block_until_ready(y2)
    assert y2.shape == (S2, B2, out2)
    assert jnp.allclose(y2, y2_ref, atol=5e-2, rtol=5e-2), "aligned-path mismatch"

    print("KERNEL_OK")
</pallas_src>

<mosaic_0001>
module attributes {stable_mosaic.version = 11 : i64} {
  func.func @_adapter_kernel(%arg0: i32, %arg1: memref<8x128xf32, #tpu.memory_space<vmem>>, %arg2: memref<128x128xf32, #tpu.memory_space<vmem>>, %arg3: memref<128x128xf32, #tpu.memory_space<vmem>>, %arg4: memref<8x128xf32, #tpu.memory_space<vmem>>) attributes {dimension_semantics = [#tpu.dimension_semantics<parallel>], iteration_bounds = array<i64: 2>, scalar_prefetch = 0 : i64, scratch_operands = 0 : i64, tpu.core_type = #tpu.core_type<tc>, window_params = [{transform_indices = @transform_0, window_bounds = array<i64: 8, 128>}, {pipeline_mode = #tpu.pipeline_mode<synchronous>, transform_indices = @transform_1, window_bounds = array<i64: 128, 128>}, {pipeline_mode = #tpu.pipeline_mode<synchronous>, transform_indices = @transform_2, window_bounds = array<i64: 128, 128>}, {transform_indices = @transform_3, window_bounds = array<i64: 8, 128>}]} {
    %c0 = arith.constant 0 : index
    %c0_0 = arith.constant 0 : index
    %0 = vector.load %arg1[%c0, %c0_0] : memref<8x128xf32, #tpu.memory_space<vmem>>, vector<8x128xf32>
    %c0_1 = arith.constant 0 : index
    %c0_2 = arith.constant 0 : index
    %1 = vector.load %arg2[%c0_1, %c0_2] : memref<128x128xf32, #tpu.memory_space<vmem>>, vector<128x128xf32>
    %cst = arith.constant dense<0.000000e+00> : vector<8x128xf32>
    %2 = tpu.matmul %0, %1, %cst {dimension_numbers = #tpu.dot_dimension_numbers<[1], [0], [0], [1], [0, 0, 1, 1], [], []>} : vector<8x128xf32>, vector<128x128xf32>, vector<8x128xf32> -> vector<8x128xf32>
    %3 = arith.negf %2 : vector<8x128xf32>
    %4 = math.exp %3 : vector<8x128xf32>
    %cst_3 = arith.constant 1.000000e+00 : f32
    %5 = vector.broadcast %cst_3 : f32 to vector<8x128xf32>
    %6 = arith.addf %5, %4 : vector<8x128xf32>
    %7 = arith.divf %5, %6 : vector<8x128xf32>
    %8 = arith.mulf %2, %7 : vector<8x128xf32>
    %c0_4 = arith.constant 0 : index
    %c0_5 = arith.constant 0 : index
    %9 = vector.load %arg3[%c0_4, %c0_5] : memref<128x128xf32, #tpu.memory_space<vmem>>, vector<128x128xf32>
    %cst_6 = arith.constant dense<0.000000e+00> : vector<8x128xf32>
    %10 = tpu.matmul %8, %9, %cst_6 {dimension_numbers = #tpu.dot_dimension_numbers<[1], [0], [0], [1], [0, 0, 1, 1], [], []>} : vector<8x128xf32>, vector<128x128xf32>, vector<8x128xf32> -> vector<8x128xf32>
    %c0_7 = arith.constant 0 : index
    %c0_8 = arith.constant 0 : index
    %11 = vector.load %arg4[%c0_7, %c0_8] : memref<8x128xf32, #tpu.memory_space<vmem>>, vector<8x128xf32>
    tpu.vector_store %arg4[%c0_7, %c0_8], %10 {strides = array<i32>} : memref<8x128xf32, #tpu.memory_space<vmem>>, vector<8x128xf32>,
    return
  }
  func.func @transform_0(%arg0: i32) -> (i32, i32) {
    %c0_i32 = arith.constant 0 : i32
    %c0_i32_0 = arith.constant 0 : i32
    return %arg0, %c0_i32 : i32, i32
  }
  func.func @transform_1(%arg0: i32) -> (i32, i32) {
    %c0_i32 = arith.constant 0 : i32
    %c0_i32_0 = arith.constant 0 : i32
    %c0_i32_1 = arith.constant 0 : i32
    return %c0_i32, %c0_i32_0 : i32, i32
  }
  func.func @transform_2(%arg0: i32) -> (i32, i32) {
    %c0_i32 = arith.constant 0 : i32
    %c0_i32_0 = arith.constant 0 : i32
    %c0_i32_1 = arith.constant 0 : i32
    return %c0_i32, %c0_i32_0 : i32, i32
  }
  func.func @transform_3(%arg0: i32) -> (i32, i32) {
    %c0_i32 = arith.constant 0 : i32
    %c0_i32_0 = arith.constant 0 : i32
    return %arg0, %c0_i32 : i32, i32
  }
}

module attributes {stable_mosaic.version = 11 : i64} {
  func.func @_adapter_kernel(%arg0: i32, %arg1: memref<8x128xf32, #tpu.memory_space<vmem>>, %arg2: memref<128x128xf32, #tpu.memory_space<vmem>>, %arg3: memref<128x128xf32, #tpu.memory_space<vmem>>, %arg4: memref<8x128xf32, #tpu.memory_space<vmem>>) attributes {dimension_semantics = [#tpu.dimension_semantics<parallel>], iteration_bounds = array<i64: 2>, scalar_prefetch = 0 : i64, scratch_operands = 0 : i64, tpu.core_type = #tpu.core_type<tc>, window_params = [{transform_indices = @transform_0, window_bounds = array<i64: 8, 128>}, {pipeline_mode = #tpu.pipeline_mode<synchronous>, transform_indices = @transform_1, window_bounds = array<i64: 128, 128>}, {pipeline_mode = #tpu.pipeline_mode<synchronous>, transform_indices = @transform_2, window_bounds = array<i64: 128, 128>}, {transform_indices = @transform_3, window_bounds = array<i64: 8, 128>}]} {
    %c0 = arith.constant 0 : index
    %c0_0 = arith.constant 0 : index
    %0 = vector.load %arg1[%c0, %c0_0] : memref<8x128xf32, #tpu.memory_space<vmem>>, vector<8x128xf32>
    %c0_1 = arith.constant 0 : index
    %c0_2 = arith.constant 0 : index
    %1 = vector.load %arg2[%c0_1, %c0_2] : memref<128x128xf32, #tpu.memory_space<vmem>>, vector<128x128xf32>
    %cst = arith.constant dense<0.000000e+00> : vector<8x128xf32>
    %2 = tpu.matmul %0, %1, %cst {dimension_numbers = #tpu.dot_dimension_numbers<[1], [0], [0], [1], [0, 0, 1, 1], [], []>} : vector<8x128xf32>, vector<128x128xf32>, vector<8x128xf32> -> vector<8x128xf32>
    %3 = arith.negf %2 : vector<8x128xf32>
    %4 = math.exp %3 : vector<8x128xf32>
    %cst_3 = arith.constant 1.000000e+00 : f32
    %5 = vector.broadcast %cst_3 : f32 to vector<8x128xf32>
    %6 = arith.addf %5, %4 : vector<8x128xf32>
    %7 = arith.divf %5, %6 : vector<8x128xf32>
    %8 = arith.mulf %2, %7 : vector<8x128xf32>
    %c0_4 = arith.constant 0 : index
    %c0_5 = arith.constant 0 : index
    %9 = vector.load %arg3[%c0_4, %c0_5] : memref<128x128xf32, #tpu.memory_space<vmem>>, vector<128x128xf32>
    %cst_6 = arith.constant dense<0.000000e+00> : vector<8x128xf32>
    %10 = tpu.matmul %8, %9, %cst_6 {dimension_numbers = #tpu.dot_dimension_numbers<[1], [0], [0], [1], [0, 0, 1, 1], [], []>} : vector<8x128xf32>, vector<128x128xf32>, vector<8x128xf32> -> vector<8x128xf32>
    %c0_7 = arith.constant 0 : index
    %c0_8 = arith.constant 0 : index
    %11 = vector.load %arg4[%c0_7, %c0_8] : memref<8x128xf32, #tpu.memory_space<vmem>>, vector<8x128xf32>
    tpu.vector_store %arg4[%c0_7, %c0_8], %10 {strides = array<i32>} : memref<8x128xf32, #tpu.memory_space<vmem>>, vector<8x128xf32>,
    return
  }
  func.func @transform_0(%arg0: i32) -> (i32, i32) {
    %c0_i32 = arith.constant 0 : i32
    %c0_i32_0 = arith.constant 0 : i32
    return %arg0, %c0_i32 : i32, i32
  }
  func.func @transform_1(%arg0: i32) -> (i32, i32) {
    %c0_i32 = arith.constant 0 : i32
    %c0_i32_0 = arith.constant 0 : i32
    %c0_i32_1 = arith.constant 0 : i32
    return %c0_i32, %c0_i32_0 : i32, i32
  }
  func.func @transform_2(%arg0: i32) -> (i32, i32) {
    %c0_i32 = arith.constant 0 : i32
    %c0_i32_0 = arith.constant 0 : i32
    %c0_i32_1 = arith.constant 0 : i32
    return %c0_i32, %c0_i32_0 : i32, i32
  }
  func.func @transform_3(%arg0: i32) -> (i32, i32) {
    %c0_i32 = arith.constant 0 : i32
    %c0_i32_0 = arith.constant 0 : i32
    return %arg0, %c0_i32 : i32, i32
  }
}

</mosaic_0001>

<bundles_post_ra>
// kernel: tpu_custom_call.1
= control target key start
LH: loop header
LB: loop body
LE: loop exit
PB: predicated region body
PF: predicated region fallthrough
CT: control target
= control target key end

     0   :  { %8 = vsyncpa [#allocation3], 0  ;;  %s1183_s0 = inlined_call_operand.hbm [shape: f32[16,128], index: 0, kind: input, shape index: {}]   ;;  %s1184_s1 = inlined_call_operand.hbm [shape: f32[128,128], index: 1, kind: input, shape index: {}]   ;;  %s1185_s2 = inlined_call_operand.hbm [shape: f32[128,128], index: 2, kind: input, shape index: {}]   ;;  %s1186_s3 = inlined_call_operand.hbm [shape: f32[16,128], index: 3, kind: output, shape index: {}]  }
   0x1   :  { %10 = vsyncpa [#allocation3 + $0x1], 0 }
   0x2   :  { %11 = vsyncpa [#allocation6], 0 }
   0x3   :  { %12 = vsyncpa [#allocation4], 0 }
   0x4   :  { %14 = vsyncpa [#allocation4 + $0x1], 0  ;;  %s931_s12 = smov 0   ;;  %s933_s13 = smov 0  }
   0x5   :  { %s935_s14 = smov 0   ;;  %s937_s15 = smov 0  }
   0x6 LB: > { %s952_s16 = sadd.s32 4294967295, %s900_s15   ;;  %s499_s17 = sadd.s32 4294967294, %s900_s15   ;;  %s900_s15 = sphi %s937_s15, %s1206_s15   ;;  %s896_s14 = sphi %s935_s14, %s1205_s14   ;;  %s892_s13 = sphi %s933_s13, %s1204_s13   ;;  %s888_s12 = sphi %s931_s12, %s1203_s12  }
   0x7   : > { %p40_p0 = scmp.ne.s32.totalorder %s892_s13, %s888_s12  ;;  %p1187_p1 = scmp.eq.s32.totalorder %s952_s16, 0 }
   0x8   : > { %p112_p3 = scmp.eq.s32.totalorder %s499_s17, 1  ;;  %p500_p5 = scmp.ge.s32.totalorder %s900_s15, 1 }
   0x9   : > { %p961_p4 = por %p1187_p1, %p40_p0  ;;  %p119_p7 = scmp.lt.s32.totalorder %s900_s15, 3 }
   0xa   : > { %p966_p6 = por %p112_p3, %p40_p0  ;;  %s902_s21 = smov [#allocation5]  }
   0xb   : > { %s1190_s18 = scalar_select %p961_p4, 1, 0 }
   0xc   : > { %s1191_s19 = scalar_select %p966_p6, 1, 0 }
   0xd   : > { %p971_p8 = pnand %p500_p5, %p119_p7  ;;  %s131_s22 = sshll.u32 %s902_s21, 4  ;;  %s975_s22 = int_to_ptr.vmem [resolvable:$true] %s131_s22 }
   0xe   : > { %s903_s24 = smov [#allocation7]   ;;  %s744_s28 = scalar_lea.hbm %s1184_s1, 2048 }
   0xf   : > { %p680_p9 = pneg %p971_p8  ;;  %s144_s25 = sshll.u32 %s903_s24, 4  ;;  %s986_s25 = int_to_ptr.vmem [resolvable:$true] %s144_s25 }
  0x10   : > { %p745_p12 = scmp.ne.s32.totalorder %s1184_s1, %s744_s28  ;;  %p751_p5 = scmp.lt.u32.totalorder %s744_s28, %s1184_s1 }
  0x11   : > { %p982_p11 = pnand %p680_p9, %p1187_p1 }
  0x13   : > { %p746_p13 = pneg %p982_p11 }
  0x15   : > { %p747_p0 = pnand %p746_p13, %p745_p12 }
  0x17   : > { %p748_p3 = pneg %p747_p0 }
  0x19   : > { %p753_p7 = pnand %p751_p5, %p748_p3 }
  0x1b   : > { %756 = shalt.err (!%p753_p7)
}
  0x1c   : > { %s757_s6 = scalar_lea.vmem %s975_s22, 2048  ;;  %p765_p2 = scmp.lt.s32.totalorder %s975_s22, %s975_s22 }
  0x1d   : > { %p758_p9 = scmp.ne.s32.totalorder %s975_s22, %s757_s6  ;;  %p766_p12 = scmp.lt.s32.totalorder %s757_s6, %s757_s6 }
  0x1f   : > { %p760_p10 = pnand %p758_p9, %p746_p13  ;;  %p767_p0 = por %p766_p12, %p765_p2 }
  0x21   : > { %p761_p1 = pneg %p760_p10 }
  0x23   : > { %p768_p6 = pnand %p767_p0, %p761_p1 }
  0x25   : > { %771 = shalt.err (!%p768_p6)
}
  0x26   : > { %s904_s7 = smov 128   ;;  %s905_s8 = smov 8  }
  0x27   : > { %683 = dma.hbm_to_vmem [thread:$0]  (!%p982_p11), %s1184_s1, 2048, %s975_s22, [#allocation6], %s904_s7, %s904_s7, %s905_s8  }
  0x28   : > { %s772_s21 = scalar_lea.hbm %s1185_s2, 2048 }
  0x29   : > { %p773_p2 = scmp.ne.s32.totalorder %s1185_s2, %s772_s21  ;;  %p779_p10 = scmp.lt.u32.totalorder %s772_s21, %s1185_s2 }
  0x2b   : > { %p775_p1 = pnand %p773_p2, %p746_p13 }
  0x2d   : > { %p776_p6 = pneg %p775_p1 }
  0x2f   : > { %p781_p3 = pnand %p779_p10, %p776_p6 }
  0x31   : > { %784 = shalt.err (!%p781_p3)
}
  0x32   : > { %s785_s22 = scalar_lea.vmem %s986_s25, 2048  ;;  %p793_p12 = scmp.lt.s32.totalorder %s986_s25, %s986_s25 }
  0x33   : > { %p786_p5 = scmp.ne.s32.totalorder %s986_s25, %s785_s22  ;;  %p794_p0 = scmp.lt.s32.totalorder %s785_s22, %s785_s22 }
  0x35   : > { %p788_p7 = pnand %p786_p5, %p746_p13  ;;  %p795_p2 = por %p794_p0, %p793_p12 }
  0x37   : > { %p789_p9 = pneg %p788_p7 }
  0x39   : > { %p796_p1 = pnand %p795_p2, %p789_p9 }
  0x3b   : > { %799 = shalt.err (!%p796_p1)
}
  0x3c   : > { %686 = dma.hbm_to_vmem [thread:$0]  (!%p982_p11), %s1185_s2, 2048, %s986_s25, [#allocation6], %s904_s7, %s904_s7, %s905_s8  }
  0x3d   : > { %s1041_s4 = sadd.s32 1, %s900_s15   ;;  %s27_s23 = sadd.s32 1, %s896_s14 }
  0x3e   : > { %s24_s5 = ssub.s32 %s900_s15, %s1041_s4  ;;  %p34_p13 = scmp.ne.s32.totalorder %s896_s14, %s892_s13 }
  0x3f   : > { %p25_p6 = scmp.eq.s32.totalorder %s24_s5, 0  ;;  %p35_p10 = scmp.eq.s32.totalorder %s900_s15, 0 }
  0x40   : > { %p1194_p3 = scmp.eq.s32.totalorder %s952_s16, 1  ;;  %p697_p7 = scmp.lt.s32.totalorder %s900_s15, 2 }
  0x41   : > { %s1057_s9 = scalar_select %p25_p6, %s896_s14, %s27_s23  }
  0x42   : > { %p1051_p5 = por %p1194_p3, %p34_p13  ;;  %p36_p9 = por %p35_p10, %p34_p13 }
  0x43   : > { %s158_s10 = sand.u32 1, %s896_s14   ;;  %s505_s25 = sshll.u32 %s900_s15, 7 }
  0x44   : > { %s1195_s6 = scalar_select %p1051_p5, 1, 0 }
  0x45   : > { %s504_s11 = sshll.u32 %s158_s10, 3  ;;  %s1064_s17 = scalar_lea.hbm %s1183_s0, %s505_s25 }
  0x46   : > { %s162_s21 = scalar_lea.vmem [#allocation2], %s504_s11  ;;  %p1068_p11 = pnand %p697_p7, %p36_p9 }
  0x47   : > { %s169_s24 = sshll.u32 %s162_s21, 4  ;;  %s159_s27 = scalar_lea.sflag [#allocation3], %s158_s10  ;;  %s1066_s24 = int_to_ptr.vmem [resolvable:$true] %s169_s24 }
  0x48   : > { %s800_s28 = scalar_lea.hbm %s1064_s17, 128  ;;  %p802_p0 = pneg %p1068_p11 }
  0x49   : > { %p801_p12 = scmp.ne.s32.totalorder %s1064_s17, %s800_s28  ;;  %s805_s30 = scalar_lea.hbm %s1183_s0, 256 }
  0x4a   : > { %p806_p13 = scmp.lt.u32.totalorder %s1064_s17, %s1183_s0  ;;  %p807_p6 = scmp.lt.u32.totalorder %s805_s30, %s800_s28 }
  0x4b   : > { %p803_p2 = pnand %p802_p0, %p801_p12  ;;  %p809_p3 = scmp.lt.u32.totalorder %s800_s28, %s1064_s17 }
  0x4c   : > { %p808_p10 = por %p807_p6, %p806_p13 }
  0x4d   : > { %p804_p1 = pneg %p803_p2 }
  0x4e   : > { %p810_p7 = por %p809_p3, %p808_p10 }
  0x50   : > { %p811_p9 = pnand %p810_p7, %p804_p1 }
  0x52   : > { %814 = shalt.err (!%p811_p9)
}
  0x53   : > { %s815_s10 = scalar_lea.vmem %s1066_s24, 128  ;;  %s906_s11 = smov [#allocation2]  }
  0x54   : > { %p816_p12 = scmp.ne.s32.totalorder %s1066_s24, %s815_s10  ;;  %s820_s25 = sshll.u32 %s906_s11, 4  ;;  %s821_s25 = int_to_ptr.vmem [resolvable:$false] %s820_s25 }
  0x55   : > { %s822_s7 = scalar_lea.vmem %s821_s25, 256  ;;  %p823_p4 = scmp.lt.s32.totalorder %s1066_s24, %s821_s25 }
  0x56   : > { %p818_p2 = pnand %p816_p12, %p802_p0  ;;  %p824_p13 = scmp.lt.s32.totalorder %s822_s7, %s815_s10 }
  0x58   : > { %p819_p5 = pneg %p818_p2  ;;  %p825_p6 = por %p824_p13, %p823_p4 }
  0x5a   : > { %p826_p10 = pnand %p825_p6, %p819_p5 }
  0x5c   : > { %829 = shalt.err (!%p826_p10)
}
  0x5d   : > { %690 = dma.hbm_to_vmem [thread:$0]  (!%p1068_p11), %s1064_s17, 128, %s1066_s24, %s159_s27  }
  0x5e   : > { %178 = sbr.rel (%p971_p8) target bundleno = 605 (0x25d), region = 32  ;;  %s1100_s8 = sand.u32 (!%p971_p8), 1, %s892_s13  }
  0x5f   : > { %s507_s21 = sshll.u32 (!%p971_p8), %s1100_s8, 3  ;;  %s181_s28 = scalar_lea.sflag (!%p971_p8), [#allocation3], %s1100_s8 }
  0x60   : > { %s1106_s22 = scalar_lea.vmem (!%p971_p8), [#allocation2], %s507_s21  ;;  %p1197_p4 = scmp.ne.s32.totalorder (!%p971_p8), %s1190_s18, 0 }
  0x65   : > { %875 = dma.done.wait (%p1197_p4), %s181_s28, 128  }
  0x66   : > { %877 = vsyncadd (%p1197_p4), %s181_s28, 4294967168  ;;  %p1198_p5 = scmp.eq.s32.totalorder %s952_s16, 0 }
  0x68   : > { %879 = dma.done.wait (%p1198_p5), [#allocation6], 4096   ;;  %p1199_p8 = pmov %p1198_p5 }
  0x69   : > { %v907_v0 = vmov 0.0|0.0   ;;  %vm908_vm0 = vmmov 0   ;;  %v909_v1 = vmov 0.0   ;;  %v216_v2 = vld [vmem:[#allocation5] sm:$0xff]  ;;  %v217_v3 = vld [vmem:[#allocation5 + $0x8] sm:$0xff]  ;;  %v218_v4 = vld [vmem:[#allocation5 + $0x10] sm:$0xff] }
  0x6a   : > { %881 = vsyncadd (%p1199_p8), [#allocation6], 4294963200  ;;  %620 = vmatprep.subr.bf16.mxu0 %v907_v0  ;;  %582 = vmatprep.mubr.msk.f32.mxu0 %vm908_vm0, %v909_v1  ;;  %v621_v5 = vpack.c.bf16 %v217_v3, %v216_v2  ;;  %v219_v6 = vld [vmem:[#allocation5 + $0x18] sm:$0xff]  ;;  %v220_v8 = vld [vmem:[#allocation5 + $0x20] sm:$0xff]  ;;  %s214_s18 = scalar_lea.vmem [#allocation8], %s507_s21  ;;  %s513_s17 = sshll.u32 %s952_s16, 7 }
  0x6b   : > { %644 = vmatprep.subr.bf16.mxu1 %v907_v0  ;;  %617 = vmatprep.mubr.msk.f32.mxu1 %vm908_vm0, %v909_v1  ;;  %v624_v7 = vpack.c.bf16 %v219_v6, %v218_v4  ;;  %v221_v9 = vld [vmem:[#allocation5 + $0x28] sm:$0xff]  ;;  %v309_v10 = vld [vmem:[#allocation7] sm:$0xff]  ;;  %v222_v14 = vld [vmem:[#allocation5 + $0x30] sm:$0xff]  ;;  %s410_s20 = sshll.u32 %s214_s18, 4  ;;  %s1141_s27 = scalar_lea.hbm %s1186_s3, %s513_s17  ;;  %s1136_s20 = int_to_ptr.vmem [resolvable:$true] %s410_s20 }
  0x6c   : > { %622 = vmatpush3.bf16.msra.mxu0 %v621_v5  ;;  %v310_v11 = vld [vmem:[#allocation7 + $0x8] sm:$0xff]  ;;  %v627_v12 = vpack.c.bf16 %v221_v9, %v220_v8  ;;  %v223_v15 = vld [vmem:[#allocation5 + $0x38] sm:$0xff]  ;;  %v224_v17 = vld [vmem:[#allocation5 + $0x40] sm:$0xff]  ;;  %s397_s29 = scalar_lea.sflag [#allocation4], %s1100_s8  ;;  %s830_s30 = scalar_lea.vmem %s1136_s20, 128 }
  0x6d   : > { %623 = vmatprep.subr.bf16.mxu0 %v907_v0  ;;  %v645_v13 = vpack.c.bf16 %v310_v11, %v309_v10  ;;  %v630_v16 = vpack.c.bf16 %v223_v15, %v222_v14  ;;  %v225_v18 = vld [vmem:[#allocation5 + $0x48] sm:$0xff]  ;;  %v226_v20 = vld [vmem:[#allocation5 + $0x50] sm:$0xff]  ;;  %v227_v21 = vld [vmem:[#allocation5 + $0x58] sm:$0xff]  ;;  %p831_p11 = scmp.ne.s32.totalorder %s1136_s20, %s830_s30  ;;  %p1200_p0 = scmp.ne.s32.totalorder %s1195_s6, 0 }
  0x6e   : > { %v633_v19 = vpack.c.bf16 %v225_v18, %v224_v17  ;;  %v636_v22 = vpack.c.bf16 %v227_v21, %v226_v20  ;;  %v228_v23 = vld [vmem:[#allocation5 + $0x60] sm:$0xff]  ;;  %v229_v24 = vld [vmem:[#allocation5 + $0x68] sm:$0xff]  ;;  %v230_v26 = vld [vmem:[#allocation5 + $0x70] sm:$0xff]  ;;  %s910_s16 = smov [#allocation8]  }
  0x6f   : > { %646 = vmatpush3.bf16.msra.mxu1 %v645_v13  ;;  %v639_v25 = vpack.c.bf16 %v229_v24, %v228_v23  ;;  %v231_v27 = vld [vmem:[#allocation5 + $0x78] sm:$0xff]  ;;  %v311_v30 = vld [vmem:[#allocation7 + $0x10] sm:$0xff]  ;;  %v313_v33 = vld [vmem:[#allocation7 + $0x20] sm:$0xff]  ;;  %p832_p1 = pnand %p831_p11, %p1200_p0  ;;  %s834_s23 = sshll.u32 %s910_s16, 4  ;;  %s835_s23 = int_to_ptr.vmem [resolvable:$false] %s834_s23 }
  0x70   : > { %625 = vmatpush3.bf16.msra.mxu0 %v624_v7  ;;  %647 = vmatprep.subr.bf16.mxu1 %v907_v0  ;;  %v642_v28 = vpack.c.bf16 %v231_v27, %v230_v26  ;;  %v215_v29 = vld [vmem:[%s1106_s22] sm:$0xff]  ;;  %v314_v34 = vld [vmem:[#allocation7 + $0x28] sm:$0xff]  ;;  %v317_v39 = vld [vmem:[#allocation7 + $0x40] sm:$0xff]  ;;  %s836_s5 = scalar_lea.vmem %s835_s23, 256  ;;  %p837_p7 = scmp.lt.s32.totalorder %s1136_s20, %s835_s23 }
  0x71   : > { %626 = vmatprep.subr.bf16.mxu0 %v907_v0  ;;  %v312_v31 = vld [vmem:[#allocation7 + $0x18] sm:$0xff]  ;;  %v651_v35 = vpack.c.bf16 %v314_v34, %v313_v33  ;;  %v315_v36 = vld [vmem:[#allocation7 + $0x30] sm:$0xff]  ;;  %v318_v40 = vld [vmem:[#allocation7 + $0x48] sm:$0xff]  ;;  %p833_p3 = pneg %p832_p1  ;;  %p838_p9 = scmp.lt.s32.totalorder %s836_s5, %s830_s30 }
  0x72   : > { %v648_v32 = vpack.c.bf16 %v312_v31, %v311_v30  ;;  %v316_v37 = vld [vmem:[#allocation7 + $0x38] sm:$0xff]  ;;  %v657_v41 = vpack.c.bf16 %v318_v40, %v317_v39  ;;  %v319_v42 = vld [vmem:[#allocation7 + $0x50] sm:$0xff]  ;;  %v321_v45 = vld [vmem:[#allocation7 + $0x60] sm:$0xff] }
  0x73   : > { %v654_v38 = vpack.c.bf16 %v316_v37, %v315_v36  ;;  %v320_v43 = vld [vmem:[#allocation7 + $0x58] sm:$0xff]  ;;  %v322_v46 = vld [vmem:[#allocation7 + $0x68] sm:$0xff]  ;;  %v323_v48 = vld [vmem:[#allocation7 + $0x70] sm:$0xff]  ;;  %p839_p12 = por %p838_p9, %p837_p7 }
  0x74   : > { %628 = vmatpush3.bf16.msra.mxu0 %v627_v12  ;;  %649 = vmatpush3.bf16.msra.mxu1 %v648_v32  ;;  %v660_v44 = vpack.c.bf16 %v320_v43, %v319_v42  ;;  %v663_v47 = vpack.c.bf16 %v322_v46, %v321_v45  ;;  %v324_v49 = vld [vmem:[#allocation7 + $0x78] sm:$0xff] }
  0x75   : > { %629 = vmatprep.subr.bf16.mxu0 %v907_v0  ;;  %650 = vmatprep.subr.bf16.mxu1 %v907_v0  ;;  %v666_v50 = vpack.c.bf16 %v324_v49, %v323_v48  ;;  %p840_p2 = pnand %p839_p12, %p833_p3 }
  0x78   : > { %631 = vmatpush3.bf16.msra.mxu0 %v630_v16  ;;  %652 = vmatpush3.bf16.msra.mxu1 %v651_v35 }
  0x79   : > { %632 = vmatprep.subr.bf16.mxu0 %v907_v0  ;;  %653 = vmatprep.subr.bf16.mxu1 %v907_v0 }
  0x7c   : > { %634 = vmatpush3.bf16.msra.mxu0 %v633_v19  ;;  %655 = vmatpush3.bf16.msra.mxu1 %v654_v38 }
  0x7d   : > { %635 = vmatprep.subr.bf16.mxu0 %v907_v0  ;;  %656 = vmatprep.subr.bf16.mxu1 %v907_v0 }
  0x80   : > { %637 = vmatpush3.bf16.msra.mxu0 %v636_v22  ;;  %658 = vmatpush3.bf16.msra.mxu1 %v657_v41 }
  0x81   : > { %638 = vmatprep.subr.bf16.mxu0 %v907_v0  ;;  %659 = vmatprep.subr.bf16.mxu1 %v907_v0 }
  0x84   : > { %640 = vmatpush3.bf16.msra.mxu0 %v639_v25  ;;  %661 = vmatpush3.bf16.msra.mxu1 %v660_v44 }
  0x85   : > { %641 = vmatprep.subr.bf16.mxu0 %v907_v0  ;;  %662 = vmatprep.subr.bf16.mxu1 %v907_v0 }
  0x88   : > { %643 = vmatpush3.bf16.msra.mxu0 %v642_v28  ;;  %664 = vmatpush3.bf16.msra.mxu1 %v663_v47 }
  0x89   : > { %665 = vmatprep.subr.bf16.mxu1 %v907_v0 }
  0x8b   : > { %583 = vmatmul.mubr.f32.vlgmr.msra.gmra.mrb[0].mxu0 %v215_v29 }
  0x8c   : > { %667 = vmatpush3.bf16.msra.mxu1 %v666_v50 }
 0x15e   : > { %v298_v51 = vpop.f32.mrb[0].mxu0 }
 0x15f   : > { %v511_v52 = vmul.f32 -1.442695, %v298_v51  ;;  %v584_v53 = vpop.f32.mrb[1].mxu0 }
 0x161   : > { %740 = vpow2.f32 %v511_v52 }
 0x16b   : > { %v741_v54 = vpop.eup %740 }
 0x16c   : > { %v305_v55 = vadd.f32 1.0, %v741_v54 }
 0x16e   : > { %742 = vrcp.f32 %v305_v55 }
 0x178   : > { %v743_v56 = vpop.eup %742 }
 0x179   : > { %v308_v57 = vmul.f32 %v743_v56, %v298_v51 }
 0x17b   : > { %618 = vmatmul.mubr.f32.vlgmr.msra.gmra.mrb[0].mxu1 %v308_v57 }
 0x24e   : > { %v391_v58 = vpop.f32.mrb[0].mxu1 }
 0x24f   : > { %395 = vst [vmem:[%s214_s18] sm:$0xff] %v391_v58  ;;  %v619_v59 = vpop.f32.mrb[1].mxu1 }
 0x250   : > { %843 = shalt.err (!%p840_p2)
}
 0x251   : > { %s844_s10 = scalar_lea.hbm %s1141_s27, 128  ;;  %s848_s7 = scalar_lea.hbm %s1186_s3, 256 }
 0x252   : > { %p845_p13 = scmp.ne.s32.totalorder %s1141_s27, %s844_s10  ;;  %p849_p4 = scmp.lt.u32.totalorder %s1141_s27, %s1186_s3 }
 0x253   : > { %p850_p5 = scmp.lt.u32.totalorder %s848_s7, %s844_s10  ;;  %p852_p11 = scmp.lt.u32.totalorder %s844_s10, %s1141_s27 }
 0x254   : > { %p846_p6 = pnand %p845_p13, %p1200_p0 }
 0x255   : > { %p851_p8 = por %p850_p5, %p849_p4 }
 0x256   : > { %p847_p10 = pneg %p846_p6 }
 0x257   : > { %p853_p1 = por %p852_p11, %p851_p8 }
 0x259   : > { %p854_p3 = pnand %p853_p1, %p847_p10 }
 0x25b   : > { %857 = shalt.err (!%p854_p3)
}
 0x25c   : > { %678 = dma.vmem_to_hbm [thread:$0]  (%p1200_p0), %s1136_s20, 128, %s1141_s27, %s397_s29  }
 0x25d PF: > { %s422_s28 = sand.u32 1, %s888_s12   ;;  %p1201_p7 = scmp.ne.s32.totalorder %s1191_s19, 0 }
 0x25e   : > { %p1202_p9 = scmp.ge.s32.totalorder %s900_s15, 2  ;;  %s423_s22 = scalar_lea.sflag [#allocation4], %s422_s28 }
 0x260   : > { %p692_p12 = pnand %p1202_p9, %p1201_p7 }
 0x262   : > { %883 = dma.done.wait (!%p692_p12), %s423_s22, 128  }
 0x263   : > { %885 = vsyncadd (!%p692_p12), %s423_s22, 4294967168  ;;  %p17_p2 = scmp.ge.s32.totalorder %s1041_s4, 4   ;;  %s1203_s12 = smov %s892_s13 }
 0x264   : > { %s1204_s13 = smov %s896_s14  ;;  %s1205_s14 = smov %s1057_s9 }
 0x265   : > { %s1206_s15 = smov %s1041_s4  ;;  %19 = sbr.rel (!%p17_p2) target bundleno = 6 (0x6), region = 85 }
 0x26c   :  { %428 = vsyncpa [#allocation3], 1 }
 0x26d   :  { %430 = vsyncpa [#allocation3 + $0x1], 1 }
 0x26e   :  { %431 = vsyncpa [#allocation6], 1 }
 0x26f   :  { %432 = vsyncpa [#allocation4], 1 }
 0x270   :  { %434 = vsyncpa [#allocation4 + $0x1], 1 }

// kernel: tpu_custom_call.1
= control target key start
LH: loop header
LB: loop body
LE: loop exit
PB: predicated region body
PF: predicated region fallthrough
CT: control target
= control target key end

     0   :  { %8 = vsyncpa [#allocation3], 0  ;;  %s1183_s0 = inlined_call_operand.hbm [shape: f32[16,128], index: 0, kind: input, shape index: {}]   ;;  %s1184_s1 = inlined_call_operand.hbm [shape: f32[128,128], index: 1, kind: input, shape index: {}]   ;;  %s1185_s2 = inlined_call_operand.hbm [shape: f32[128,128], index: 2, kind: input, shape index: {}]   ;;  %s1186_s3 = inlined_call_operand.hbm [shape: f32[16,128], index: 3, kind: output, shape index: {}]  }
   0x1   :  { %10 = vsyncpa [#allocation3 + $0x1], 0 }
   0x2   :  { %11 = vsyncpa [#allocation6], 0 }
   0x3   :  { %12 = vsyncpa [#allocation4], 0 }
   0x4   :  { %14 = vsyncpa [#allocation4 + $0x1], 0  ;;  %s931_s12 = smov 0   ;;  %s933_s13 = smov 0  }
   0x5   :  { %s935_s14 = smov 0   ;;  %s937_s15 = smov 0  }
   0x6 LB: > { %s952_s16 = sadd.s32 4294967295, %s900_s15   ;;  %s499_s17 = sadd.s32 4294967294, %s900_s15   ;;  %s900_s15 = sphi %s937_s15, %s1206_s15   ;;  %s896_s14 = sphi %s935_s14, %s1205_s14   ;;  %s892_s13 = sphi %s933_s13, %s1204_s13   ;;  %s888_s12 = sphi %s931_s12, %s1203_s12  }
   0x7   : > { %p40_p0 = scmp.ne.s32.totalorder %s892_s13, %s888_s12  ;;  %p1187_p1 = scmp.eq.s32.totalorder %s952_s16, 0 }
   0x8   : > { %p112_p3 = scmp.eq.s32.totalorder %s499_s17, 1  ;;  %p500_p5 = scmp.ge.s32.totalorder %s900_s15, 1 }
   0x9   : > { %p961_p4 = por %p1187_p1, %p40_p0  ;;  %p119_p7 = scmp.lt.s32.totalorder %s900_s15, 3 }
   0xa   : > { %p966_p6 = por %p112_p3, %p40_p0  ;;  %s902_s21 = smov [#allocation5]  }
   0xb   : > { %s1190_s18 = scalar_select %p961_p4, 1, 0 }
   0xc   : > { %s1191_s19 = scalar_select %p966_p6, 1, 0 }
   0xd   : > { %p971_p8 = pnand %p500_p5, %p119_p7  ;;  %s131_s22 = sshll.u32 %s902_s21, 4  ;;  %s975_s22 = int_to_ptr.vmem [resolvable:$true] %s131_s22 }
   0xe   : > { %s903_s24 = smov [#allocation7]   ;;  %s744_s28 = scalar_lea.hbm %s1184_s1, 2048 }
   0xf   : > { %p680_p9 = pneg %p971_p8  ;;  %s144_s25 = sshll.u32 %s903_s24, 4  ;;  %s986_s25 = int_to_ptr.vmem [resolvable:$true] %s144_s25 }
  0x10   : > { %p745_p12 = scmp.ne.s32.totalorder %s1184_s1, %s744_s28  ;;  %p751_p5 = scmp.lt.u32.totalorder %s744_s28, %s1184_s1 }
  0x11   : > { %p982_p11 = pnand %p680_p9, %p1187_p1 }
  0x13   : > { %p746_p13 = pneg %p982_p11 }
  0x15   : > { %p747_p0 = pnand %p746_p13, %p745_p12 }
  0x17   : > { %p748_p3 = pneg %p747_p0 }
  0x19   : > { %p753_p7 = pnand %p751_p5, %p748_p3 }
  0x1b   : > { %756 = shalt.err (!%p753_p7)
}
  0x1c   : > { %s757_s6 = scalar_lea.vmem %s975_s22, 2048  ;;  %p765_p2 = scmp.lt.s32.totalorder %s975_s22, %s975_s22 }
  0x1d   : > { %p758_p9 = scmp.ne.s32.totalorder %s975_s22, %s757_s6  ;;  %p766_p12 = scmp.lt.s32.totalorder %s757_s6, %s757_s6 }
  0x1f   : > { %p760_p10 = pnand %p758_p9, %p746_p13  ;;  %p767_p0 = por %p766_p12, %p765_p2 }
  0x21   : > { %p761_p1 = pneg %p760_p10 }
  0x23   : > { %p768_p6 = pnand %p767_p0, %p761_p1 }
  0x25   : > { %771 = shalt.err (!%p768_p6)
}
  0x26   : > { %s904_s7 = smov 128   ;;  %s905_s8 = smov 8  }
  0x27   : > { %683 = dma.hbm_to_vmem [thread:$0]  (!%p982_p11), %s1184_s1, 2048, %s975_s22, [#allocation6], %s904_s7, %s904_s7, %s905_s8  }
  0x28   : > { %s772_s21 = scalar_lea.hbm %s1185_s2, 2048 }
  0x29   : > { %p773_p2 = scmp.ne.s32.totalorder %s1185_s2, %s772_s21  ;;  %p779_p10 = scmp.lt.u32.totalorder %s772_s21, %s1185_s2 }
  0x2b   : > { %p775_p1 = pnand %p773_p2, %p746_p13 }
  0x2d   : > { %p776_p6 = pneg %p775_p1 }
  0x2f   : > { %p781_p3 = pnand %p779_p10, %p776_p6 }
  0x31   : > { %784 = shalt.err (!%p781_p3)
}
  0x32   : > { %s785_s22 = scalar_lea.vmem %s986_s25, 2048  ;;  %p793_p12 = scmp.lt.s32.totalorder %s986_s25, %s986_s25 }
  0x33   : > { %p786_p5 = scmp.ne.s32.totalorder %s986_s25, %s785_s22  ;;  %p794_p0 = scmp.lt.s32.totalorder %s785_s22, %s785_s22 }
  0x35   : > { %p788_p7 = pnand %p786_p5, %p746_p13  ;;  %p795_p2 = por %p794_p0, %p793_p12 }
  0x37   : > { %p789_p9 = pneg %p788_p7 }
  0x39   : > { %p796_p1 = pnand %p795_p2, %p789_p9 }
  0x3b   : > { %799 = shalt.err (!%p796_p1)
}
  0x3c   : > { %686 = dma.hbm_to_vmem [thread:$0]  (!%p982_p11), %s1185_s2, 2048, %s986_s25, [#allocation6], %s904_s7, %s904_s7, %s905_s8  }
  0x3d   : > { %s1041_s4 = sadd.s32 1, %s900_s15   ;;  %s27_s23 = sadd.s32 1, %s896_s14 }
  0x3e   : > { %s24_s5 = ssub.s32 %s900_s15, %s1041_s4  ;;  %p34_p13 = scmp.ne.s32.totalorder %s896_s14, %s892_s13 }
  0x3f   : > { %p25_p6 = scmp.eq.s32.totalorder %s24_s5, 0  ;;  %p35_p10 = scmp.eq.s32.totalorder %s900_s15, 0 }
  0x40   : > { %p1194_p3 = scmp.eq.s32.totalorder %s952_s16, 1  ;;  %p697_p7 = scmp.lt.s32.totalorder %s900_s15, 2 }
  0x41   : > { %s1057_s9 = scalar_select %p25_p6, %s896_s14, %s27_s23  }
  0x42   : > { %p1051_p5 = por %p1194_p3, %p34_p13  ;;  %p36_p9 = por %p35_p10, %p34_p13 }
  0x43   : > { %s158_s10 = sand.u32 1, %s896_s14   ;;  %s505_s25 = sshll.u32 %s900_s15, 7 }
  0x44   : > { %s1195_s6 = scalar_select %p1051_p5, 1, 0 }
  0x45   : > { %s504_s11 = sshll.u32 %s158_s10, 3  ;;  %s1064_s17 = scalar_lea.hbm %s1183_s0, %s505_s25 }
  0x46   : > { %s162_s21 = scalar_lea.vmem [#allocation2], %s504_s11  ;;  %p1068_p11 = pnand %p697_p7, %p36_p9 }
  0x47   : > { %s169_s24 = sshll.u32 %s162_s21, 4  ;;  %s159_s27 = scalar_lea.sflag [#allocation3], %s158_s10  ;;  %s1066_s24 = int_to_ptr.vmem [resolvable:$true] %s169_s24 }
  0x48   : > { %s800_s28 = scalar_lea.hbm %s1064_s17, 128  ;;  %p802_p0 = pneg %p1068_p11 }
  0x49   : > { %p801_p12 = scmp.ne.s32.totalorder %s1064_s17, %s800_s28  ;;  %s805_s30 = scalar_lea.hbm %s1183_s0, 256 }
  0x4a   : > { %p806_p13 = scmp.lt.u32.totalorder %s1064_s17, %s1183_s0  ;;  %p807_p6 = scmp.lt.u32.totalorder %s805_s30, %s800_s28 }
  0x4b   : > { %p803_p2 = pnand %p802_p0, %p801_p12  ;;  %p809_p3 = scmp.lt.u32.totalorder %s800_s28, %s1064_s17 }
  0x4c   : > { %p808_p10 = por %p807_p6, %p806_p13 }
  0x4d   : > { %p804_p1 = pneg %p803_p2 }
  0x4e   : > { %p810_p7 = por %p809_p3, %p808_p10 }
  0x50   : > { %p811_p9 = pnand %p810_p7, %p804_p1 }
  0x52   : > { %814 = shalt.err (!%p811_p9)
}
  0x53   : > { %s815_s10 = scalar_lea.vmem %s1066_s24, 128  ;;  %s906_s11 = smov [#allocation2]  }
  0x54   : > { %p816_p12 = scmp.ne.s32.totalorder %s1066_s24, %s815_s10  ;;  %s820_s25 = sshll.u32 %s906_s11, 4  ;;  %s821_s25 = int_to_ptr.vmem [resolvable:$false] %s820_s25 }
  0x55   : > { %s822_s7 = scalar_lea.vmem %s821_s25, 256  ;;  %p823_p4 = scmp.lt.s32.totalorder %s1066_s24, %s821_s25 }
  0x56   : > { %p818_p2 = pnand %p816_p12, %p802_p0  ;;  %p824_p13 = scmp.lt.s32.totalorder %s822_s7, %s815_s10 }
  0x58   : > { %p819_p5 = pneg %p818_p2  ;;  %p825_p6 = por %p824_p13, %p823_p4 }
  0x5a   : > { %p826_p10 = pnand %p825_p6, %p819_p5 }
  0x5c   : > { %829 = shalt.err (!%p826_p10)
}
  0x5d   : > { %690 = dma.hbm_to_vmem [thread:$0]  (!%p1068_p11), %s1064_s17, 128, %s1066_s24, %s159_s27  }
  0x5e   : > { %178 = sbr.rel (%p971_p8) target bundleno = 605 (0x25d), region = 32  ;;  %s1100_s8 = sand.u32 (!%p971_p8), 1, %s892_s13  }
  0x5f   : > { %s507_s21 = sshll.u32 (!%p971_p8), %s1100_s8, 3  ;;  %s181_s28 = scalar_lea.sflag (!%p971_p8), [#allocation3], %s1100_s8 }
  0x60   : > { %s1106_s22 = scalar_lea.vmem (!%p971_p8), [#allocation2], %s507_s21  ;;  %p1197_p4 = scmp.ne.s32.totalorder (!%p971_p8), %s1190_s18, 0 }
  0x65   : > { %875 = dma.done.wait (%p1197_p4), %s181_s28, 128  }
  0x66   : > { %877 = vsyncadd (%p1197_p4), %s181_s28, 4294967168  ;;  %p1198_p5 = scmp.eq.s32.totalorder %s952_s16, 0 }
  0x68   : > { %879 = dma.done.wait (%p1198_p5), [#allocation6], 4096   ;;  %p1199_p8 = pmov %p1198_p5 }
  0x69   : > { %v907_v0 = vmov 0.0|0.0   ;;  %vm908_vm0 = vmmov 0   ;;  %v909_v1 = vmov 0.0   ;;  %v216_v2 = vld [vmem:[#allocation5] sm:$0xff]  ;;  %v217_v3 = vld [vmem:[#allocation5 + $0x8] sm:$0xff]  ;;  %v218_v4 = vld [vmem:[#allocation5 + $0x10] sm:$0xff] }
  0x6a   : > { %881 = vsyncadd (%p1199_p8), [#allocation6], 4294963200  ;;  %620 = vmatprep.subr.bf16.mxu0 %v907_v0  ;;  %582 = vmatprep.mubr.msk.f32.mxu0 %vm908_vm0, %v909_v1  ;;  %v621_v5 = vpack.c.bf16 %v217_v3, %v216_v2  ;;  %v219_v6 = vld [vmem:[#allocation5 + $0x18] sm:$0xff]  ;;  %v220_v8 = vld [vmem:[#allocation5 + $0x20] sm:$0xff]  ;;  %s214_s18 = scalar_lea.vmem [#allocation8], %s507_s21  ;;  %s513_s17 = sshll.u32 %s952_s16, 7 }
  0x6b   : > { %644 = vmatprep.subr.bf16.mxu1 %v907_v0  ;;  %617 = vmatprep.mubr.msk.f32.mxu1 %vm908_vm0, %v909_v1  ;;  %v624_v7 = vpack.c.bf16 %v219_v6, %v218_v4  ;;  %v221_v9 = vld [vmem:[#allocation5 + $0x28] sm:$0xff]  ;;  %v309_v10 = vld [vmem:[#allocation7] sm:$0xff]  ;;  %v222_v14 = vld [vmem:[#allocation5 + $0x30] sm:$0xff]  ;;  %s410_s20 = sshll.u32 %s214_s18, 4  ;;  %s1141_s27 = scalar_lea.hbm %s1186_s3, %s513_s17  ;;  %s1136_s20 = int_to_ptr.vmem [resolvable:$true] %s410_s20 }
  0x6c   : > { %622 = vmatpush3.bf16.msra.mxu0 %v621_v5  ;;  %v310_v11 = vld [vmem:[#allocation7 + $0x8] sm:$0xff]  ;;  %v627_v12 = vpack.c.bf16 %v221_v9, %v220_v8  ;;  %v223_v15 = vld [vmem:[#allocation5 + $0x38] sm:$0xff]  ;;  %v224_v17 = vld [vmem:[#allocation5 + $0x40] sm:$0xff]  ;;  %s397_s29 = scalar_lea.sflag [#allocation4], %s1100_s8  ;;  %s830_s30 = scalar_lea.vmem %s1136_s20, 128 }
  0x6d   : > { %623 = vmatprep.subr.bf16.mxu0 %v907_v0  ;;  %v645_v13 = vpack.c.bf16 %v310_v11, %v309_v10  ;;  %v630_v16 = vpack.c.bf16 %v223_v15, %v222_v14  ;;  %v225_v18 = vld [vmem:[#allocation5 + $0x48] sm:$0xff]  ;;  %v226_v20 = vld [vmem:[#allocation5 + $0x50] sm:$0xff]  ;;  %v227_v21 = vld [vmem:[#allocation5 + $0x58] sm:$0xff]  ;;  %p831_p11 = scmp.ne.s32.totalorder %s1136_s20, %s830_s30  ;;  %p1200_p0 = scmp.ne.s32.totalorder %s1195_s6, 0 }
  0x6e   : > { %v633_v19 = vpack.c.bf16 %v225_v18, %v224_v17  ;;  %v636_v22 = vpack.c.bf16 %v227_v21, %v226_v20  ;;  %v228_v23 = vld [vmem:[#allocation5 + $0x60] sm:$0xff]  ;;  %v229_v24 = vld [vmem:[#allocation5 + $0x68] sm:$0xff]  ;;  %v230_v26 = vld [vmem:[#allocation5 + $0x70] sm:$0xff]  ;;  %s910_s16 = smov [#allocation8]  }
  0x6f   : > { %646 = vmatpush3.bf16.msra.mxu1 %v645_v13  ;;  %v639_v25 = vpack.c.bf16 %v229_v24, %v228_v23  ;;  %v231_v27 = vld [vmem:[#allocation5 + $0x78] sm:$0xff]  ;;  %v311_v30 = vld [vmem:[#allocation7 + $0x10] sm:$0xff]  ;;  %v313_v33 = vld [vmem:[#allocation7 + $0x20] sm:$0xff]  ;;  %p832_p1 = pnand %p831_p11, %p1200_p0  ;;  %s834_s23 = sshll.u32 %s910_s16, 4  ;;  %s835_s23 = int_to_ptr.vmem [resolvable:$false] %s834_s23 }
  0x70   : > { %625 = vmatpush3.bf16.msra.mxu0 %v624_v7  ;;  %647 = vmatprep.subr.bf16.mxu1 %v907_v0  ;;  %v642_v28 = vpack.c.bf16 %v231_v27, %v230_v26  ;;  %v215_v29 = vld [vmem:[%s1106_s22] sm:$0xff]  ;;  %v314_v34 = vld [vmem:[#allocation7 + $0x28] sm:$0xff]  ;;  %v317_v39 = vld [vmem:[#allocation7 + $0x40] sm:$0xff]  ;;  %s836_s5 = scalar_lea.vmem %s835_s23, 256  ;;  %p837_p7 = scmp.lt.s32.totalorder %s1136_s20, %s835_s23 }
  0x71   : > { %626 = vmatprep.subr.bf16.mxu0 %v907_v0  ;;  %v312_v31 = vld [vmem:[#allocation7 + $0x18] sm:$0xff]  ;;  %v651_v35 = vpack.c.bf16 %v314_v34, %v313_v33  ;;  %v315_v36 = vld [vmem:[#allocation7 + $0x30] sm:$0xff]  ;;  %v318_v40 = vld [vmem:[#allocation7 + $0x48] sm:$0xff]  ;;  %p833_p3 = pneg %p832_p1  ;;  %p838_p9 = scmp.lt.s32.totalorder %s836_s5, %s830_s30 }
  0x72   : > { %v648_v32 = vpack.c.bf16 %v312_v31, %v311_v30  ;;  %v316_v37 = vld [vmem:[#allocation7 + $0x38] sm:$0xff]  ;;  %v657_v41 = vpack.c.bf16 %v318_v40, %v317_v39  ;;  %v319_v42 = vld [vmem:[#allocation7 + $0x50] sm:$0xff]  ;;  %v321_v45 = vld [vmem:[#allocation7 + $0x60] sm:$0xff] }
  0x73   : > { %v654_v38 = vpack.c.bf16 %v316_v37, %v315_v36  ;;  %v320_v43 = vld [vmem:[#allocation7 + $0x58] sm:$0xff]  ;;  %v322_v46 = vld [vmem:[#allocation7 + $0x68] sm:$0xff]  ;;  %v323_v48 = vld [vmem:[#allocation7 + $0x70] sm:$0xff]  ;;  %p839_p12 = por %p838_p9, %p837_p7 }
  0x74   : > { %628 = vmatpush3.bf16.msra.mxu0 %v627_v12  ;;  %649 = vmatpush3.bf16.msra.mxu1 %v648_v32  ;;  %v660_v44 = vpack.c.bf16 %v320_v43, %v319_v42  ;;  %v663_v47 = vpack.c.bf16 %v322_v46, %v321_v45  ;;  %v324_v49 = vld [vmem:[#allocation7 + $0x78] sm:$0xff] }
  0x75   : > { %629 = vmatprep.subr.bf16.mxu0 %v907_v0  ;;  %650 = vmatprep.subr.bf16.mxu1 %v907_v0  ;;  %v666_v50 = vpack.c.bf16 %v324_v49, %v323_v48  ;;  %p840_p2 = pnand %p839_p12, %p833_p3 }
  0x78   : > { %631 = vmatpush3.bf16.msra.mxu0 %v630_v16  ;;  %652 = vmatpush3.bf16.msra.mxu1 %v651_v35 }
  0x79   : > { %632 = vmatprep.subr.bf16.mxu0 %v907_v0  ;;  %653 = vmatprep.subr.bf16.mxu1 %v907_v0 }
  0x7c   : > { %634 = vmatpush3.bf16.msra.mxu0 %v633_v19  ;;  %655 = vmatpush3.bf16.msra.mxu1 %v654_v38 }
  0x7d   : > { %635 = vmatprep.subr.bf16.mxu0 %v907_v0  ;;  %656 = vmatprep.subr.bf16.mxu1 %v907_v0 }
  0x80   : > { %637 = vmatpush3.bf16.msra.mxu0 %v636_v22  ;;  %658 = vmatpush3.bf16.msra.mxu1 %v657_v41 }
  0x81   : > { %638 = vmatprep.subr.bf16.mxu0 %v907_v0  ;;  %659 = vmatprep.subr.bf16.mxu1 %v907_v0 }
  0x84   : > { %640 = vmatpush3.bf16.msra.mxu0 %v639_v25  ;;  %661 = vmatpush3.bf16.msra.mxu1 %v660_v44 }
  0x85   : > { %641 = vmatprep.subr.bf16.mxu0 %v907_v0  ;;  %662 = vmatprep.subr.bf16.mxu1 %v907_v0 }
  0x88   : > { %643 = vmatpush3.bf16.msra.mxu0 %v642_v28  ;;  %664 = vmatpush3.bf16.msra.mxu1 %v663_v47 }
  0x89   : > { %665 = vmatprep.subr.bf16.mxu1 %v907_v0 }
  0x8b   : > { %583 = vmatmul.mubr.f32.vlgmr.msra.gmra.mrb[0].mxu0 %v215_v29 }
  0x8c   : > { %667 = vmatpush3.bf16.msra.mxu1 %v666_v50 }
 0x15e   : > { %v298_v51 = vpop.f32.mrb[0].mxu0 }
 0x15f   : > { %v511_v52 = vmul.f32 -1.442695, %v298_v51  ;;  %v584_v53 = vpop.f32.mrb[1].mxu0 }
 0x161   : > { %740 = vpow2.f32 %v511_v52 }
 0x16b   : > { %v741_v54 = vpop.eup %740 }
 0x16c   : > { %v305_v55 = vadd.f32 1.0, %v741_v54 }
 0x16e   : > { %742 = vrcp.f32 %v305_v55 }
 0x178   : > { %v743_v56 = vpop.eup %742 }
 0x179   : > { %v308_v57 = vmul.f32 %v743_v56, %v298_v51 }
 0x17b   : > { %618 = vmatmul.mubr.f32.vlgmr.msra.gmra.mrb[0].mxu1 %v308_v57 }
 0x24e   : > { %v391_v58 = vpop.f32.mrb[0].mxu1 }
 0x24f   : > { %395 = vst [vmem:[%s214_s18] sm:$0xff] %v391_v58  ;;  %v619_v59 = vpop.f32.mrb[1].mxu1 }
 0x250   : > { %843 = shalt.err (!%p840_p2)
}
 0x251   : > { %s844_s10 = scalar_lea.hbm %s1141_s27, 128  ;;  %s848_s7 = scalar_lea.hbm %s1186_s3, 256 }
 0x252   : > { %p845_p13 = scmp.ne.s32.totalorder %s1141_s27, %s844_s10  ;;  %p849_p4 = scmp.lt.u32.totalorder %s1141_s27, %s1186_s3 }
 0x253   : > { %p850_p5 = scmp.lt.u32.totalorder %s848_s7, %s844_s10  ;;  %p852_p11 = scmp.lt.u32.totalorder %s844_s10, %s1141_s27 }
 0x254   : > { %p846_p6 = pnand %p845_p13, %p1200_p0 }
 0x255   : > { %p851_p8 = por %p850_p5, %p849_p4 }
 0x256   : > { %p847_p10 = pneg %p846_p6 }
 0x257   : > { %p853_p1 = por %p852_p11, %p851_p8 }
 0x259   : > { %p854_p3 = pnand %p853_p1, %p847_p10 }
 0x25b   : > { %857 = shalt.err (!%p854_p3)
}
 0x25c   : > { %678 = dma.vmem_to_hbm [thread:$0]  (%p1200_p0), %s1136_s20, 128, %s1141_s27, %s397_s29  }
 0x25d PF: > { %s422_s28 = sand.u32 1, %s888_s12   ;;  %p1201_p7 = scmp.ne.s32.totalorder %s1191_s19, 0 }
 0x25e   : > { %p1202_p9 = scmp.ge.s32.totalorder %s900_s15, 2  ;;  %s423_s22 = scalar_lea.sflag [#allocation4], %s422_s28 }
 0x260   : > { %p692_p12 = pnand %p1202_p9, %p1201_p7 }
 0x262   : > { %883 = dma.done.wait (!%p692_p12), %s423_s22, 128  }
 0x263   : > { %885 = vsyncadd (!%p692_p12), %s423_s22, 4294967168  ;;  %p17_p2 = scmp.ge.s32.totalorder %s1041_s4, 4   ;;  %s1203_s12 = smov %s892_s13 }
 0x264   : > { %s1204_s13 = smov %s896_s14  ;;  %s1205_s14 = smov %s1057_s9 }
 0x265   : > { %s1206_s15 = smov %s1041_s4  ;;  %19 = sbr.rel (!%p17_p2) target bundleno = 6 (0x6), region = 85 }
 0x26c   :  { %428 = vsyncpa [#allocation3], 1 }
 0x26d   :  { %430 = vsyncpa [#allocation3 + $0x1], 1 }
 0x26e   :  { %431 = vsyncpa [#allocation6], 1 }
 0x26f   :  { %432 = vsyncpa [#allocation4], 1 }
 0x270   :  { %434 = vsyncpa [#allocation4 + $0x1], 1 }

</bundles_post_ra>
